<compile_context>
chip_gen: v7x
topology: tpu7x:2x2x1
jax: 0.10.0
libtpu: 0.0.40
codegen_flags: <defaults>
</compile_context>

<pallas_src>
import functools

import jax
import jax.numpy as jnp
from jax import lax
from jax.experimental import pallas as pl
from jax.experimental.pallas import tpu as pltpu


def _focal_loss_kernel(logits_ref, labels_ref, out_ref, acc_pow_ref, acc_log_ref,
                       *, gamma, h_total, mask_rows):
    n = pl.program_id(1)

    lg = logits_ref[...].astype(jnp.float32)     # (C, th, W)
    lab = labels_ref[...].astype(jnp.float32)    # (C, th, W)
    num_classes = lab.shape[0]
    th = lab.shape[1]

    # one_hot(argmax(labels, class axis)) with first-maximum tie-breaking, then
    # pk = logits[argmax].  All reductions are over the outer class axis (3
    # planes), i.e. pure elementwise VPU ops on dense (th, W) tiles.
    cls = lax.broadcasted_iota(jnp.int32, lab.shape, 0)
    cls_max = jnp.max(lab, axis=0, keepdims=True)                    # (1, th, W)
    first_idx = jnp.min(jnp.where(lab == cls_max, cls, num_classes),
                        axis=0, keepdims=True)                       # (1, th, W)
    pk = jnp.sum(jnp.where(cls == first_idx, lg, 0.0), axis=0)       # (th, W)

    if mask_rows:
        # Rows past the true H in the last (partial) h-block hold garbage;
        # force pk = 1.0 there so both terms contribute exactly zero.
        row = lax.broadcasted_iota(jnp.int32, pk.shape, 0)
        valid = (pl.program_id(0) * th + row) < h_total
        pk = jnp.where(valid, pk, 1.0)

    one_minus = 1.0 - pk
    if float(gamma).is_integer():
        pow_term = lax.integer_pow(one_minus, int(gamma))
    else:
        # TODO(synk): non-integer gamma with negative base gives NaN (matches torch.pow)
        pow_term = jnp.power(one_minus, gamma)
    log_term = jnp.log(jnp.clip(pk, 1e-12, 1.0))

    # Per-element partial sums, resident in VMEM across the inner N loop.
    @pl.when(n == 0)
    def _init():
        acc_pow_ref[...] = pow_term
        acc_log_ref[...] = log_term

    @pl.when(n > 0)
    def _accum():
        acc_pow_ref[...] += pow_term
        acc_log_ref[...] += log_term

    # Single cross-lane reduction per h-block, only on the last inner step.
    @pl.when(n == pl.num_programs(1) - 1)
    def _finalize():
        out_ref[0, 0] = jnp.sum(acc_pow_ref[...])
        out_ref[0, 1] = jnp.sum(acc_log_ref[...])


def _pick_tile_h(H, W, C, itemsize, target_bytes):
    """Largest H-tile (multiple of 8, or full H) with ~target_bytes per input block."""
    w_pad = ((W + 127) // 128) * 128           # lanes are padded to 128 in VMEM
    per_row_bytes = C * w_pad * itemsize
    th = target_bytes // per_row_bytes
    if th >= H:
        return int(H)                           # one block covers all rows
    th = (th // 8) * 8                          # keep the (8,128) block rule
    if th < 8:
        th = 8 if H >= 8 else H
    return int(th)


def focal_loss(logits, labels, weight=1.0, alpha=0.25, gamma=2.0,
               num_classes=3, target_block_bytes=2 * 1024 * 1024):
    """logits, labels: (N, num_classes, H, W) arrays (NCHW, like the PyTorch module)."""
    N, C, H, W = logits.shape
    assert C == num_classes and labels.shape == logits.shape

    itemsize = jnp.dtype(logits.dtype).itemsize
    th = _pick_tile_h(H, W, C, itemsize, target_block_bytes)
    grid_h = pl.cdiv(H, th)
    mask_rows = (grid_h * th) != H

    kernel = functools.partial(_focal_loss_kernel, gamma=float(gamma),
                               h_total=H, mask_rows=mask_rows)

    # Read NCHW in place: no transpose / reshape / pad in the wrapper.
    in_spec = pl.BlockSpec((None, C, th, W), lambda h, n: (n, 0, h, 0))

    partials = pl.pallas_call(
        kernel,
        out_shape=jax.ShapeDtypeStruct((grid_h, 2), jnp.float32),
        grid_spec=pltpu.PrefetchScalarGridSpec(
            num_scalar_prefetch=0,
            grid=(grid_h, N),                    # h-blocks parallel, N reduced
            in_specs=[in_spec, in_spec],
            out_specs=pl.BlockSpec((1, 2), lambda h, n: (h, 0),
                                   memory_space=pltpu.SMEM),
            scratch_shapes=[pltpu.VMEM((th, W), jnp.float32),
                            pltpu.VMEM((th, W), jnp.float32)]),
        compiler_params=pltpu.CompilerParams(
            dimension_semantics=("parallel", "arbitrary"),
            vmem_limit_bytes=32 * 1024 * 1024),
    )(logits, labels)

    # Tiny final combine (2 scalars per h-block) stays in plain JAX.
    total = jnp.float32(N * H * W)
    mean_pow = jnp.sum(partials[:, 0]) / total
    mean_log = jnp.sum(partials[:, 1]) / total
    return weight * (-alpha) * mean_pow * mean_log


def _focal_loss_ref(logits, labels, weight=1.0, alpha=0.25, gamma=2.0,
                    num_classes=3):
    """Pure-JAX reference mirroring the PyTorch forward, for validation."""
    lab_idx = jnp.argmax(labels, axis=1)
    lg = jnp.transpose(logits, (0, 2, 3, 1)).reshape(-1, num_classes)
    lab = jax.nn.one_hot(lab_idx.reshape(-1), num_classes, dtype=lg.dtype)
    pk = jnp.sum(lg * lab, axis=1, keepdims=True)
    f1 = -alpha * jnp.mean((1.0 - pk) ** gamma) * jnp.log(
        jnp.clip(pk, 1e-12, 1.0))
    return weight * jnp.sum(jnp.mean(f1))


if __name__ == "__main__":
    key = jax.random.PRNGKey(0)
    k1, k2, k3, k4 = jax.random.split(key, 4)

    # 1) small shape consistent with the module defaults (num_classes = 3)
    N, C, H, W = 2, 3, 16, 16
    logits = jax.random.normal(k1, (N, C, H, W), dtype=jnp.float32)
    labels = jax.random.normal(k2, (N, C, H, W), dtype=jnp.float32)
    out = jax.block_until_ready(focal_loss(logits, labels, 1.0, 0.25, 2.0, C))
    ref = _focal_loss_ref(logits, labels, 1.0, 0.25, 2.0, C)
    assert jnp.allclose(out, ref, rtol=1e-5, atol=1e-6), (out, ref)

    # 2) force small H-tiles to exercise the multi-block parallel axis and the
    #    in-kernel tail-row masking path (H=20, th=8 -> 3 blocks, masked tail).
    N2, C2, H2, W2 = 2, 3, 20, 16
    logits2 = jax.random.normal(k3, (N2, C2, H2, W2), dtype=jnp.float32)
    labels2 = jax.random.normal(k4, (N2, C2, H2, W2), dtype=jnp.float32)
    out2 = jax.block_until_ready(
        focal_loss(logits2, labels2, 1.0, 0.25, 2.0, C2,
                   target_block_bytes=9 * 1536))
    ref2 = _focal_loss_ref(logits2, labels2, 1.0, 0.25, 2.0, C2)
    assert jnp.allclose(out2, ref2, rtol=1e-5, atol=1e-6), (out2, ref2)

    print("KERNEL_OK")
</pallas_src>

<mosaic_0001>
module attributes {stable_mosaic.version = 11 : i64} {
  func.func @_focal_loss_kernel(%arg0: i32, %arg1: i32, %arg2: memref<1x3x16x16xf32, #tpu.memory_space<vmem>>, %arg3: memref<1x3x16x16xf32, #tpu.memory_space<vmem>>, %arg4: memref<1x2xf32, #tpu.memory_space<smem>>, %arg5: memref<16x16xf32, #tpu.memory_space<vmem>>, %arg6: memref<16x16xf32, #tpu.memory_space<vmem>>) attributes {dimension_semantics = [#tpu.dimension_semantics<parallel>, #tpu.dimension_semantics<arbitrary>], iteration_bounds = array<i64: 1, 2>, scalar_prefetch = 0 : i64, scratch_operands = 2 : i64, tpu.core_type = #tpu.core_type<tc>, window_params = [{transform_indices = @transform_0, window_bounds = array<i64: 1, 3, 16, 16>}, {transform_indices = @transform_1, window_bounds = array<i64: 1, 3, 16, 16>}, {transform_indices = @transform_2, window_bounds = array<i64: 1, 2>}]} {
    %c0 = arith.constant 0 : index
    %c0_0 = arith.constant 0 : index
    %c0_1 = arith.constant 0 : index
    %c0_2 = arith.constant 0 : index
    %0 = vector.load %arg2[%c0, %c0_0, %c0_1, %c0_2] : memref<1x3x16x16xf32, #tpu.memory_space<vmem>>, vector<1x3x16x16xf32>
    %1 = vector.shape_cast %0 : vector<1x3x16x16xf32> to vector<3x16x16xf32>
    %c0_3 = arith.constant 0 : index
    %c0_4 = arith.constant 0 : index
    %c0_5 = arith.constant 0 : index
    %c0_6 = arith.constant 0 : index
    %2 = vector.load %arg3[%c0_3, %c0_4, %c0_5, %c0_6] : memref<1x3x16x16xf32, #tpu.memory_space<vmem>>, vector<1x3x16x16xf32>
    %3 = vector.shape_cast %2 : vector<1x3x16x16xf32> to vector<3x16x16xf32>
    %4 = tpu.iota {dimensions = array<i32: 0>} : vector<3x16x16xi32>
    %cst = arith.constant dense<0xFF800000> : vector<16x16xf32>
    %5 = vector.multi_reduction <maximumf>, %3, %cst [0] : vector<3x16x16xf32> to vector<16x16xf32>
    %6 = vector.shape_cast %5 : vector<16x16xf32> to vector<1x16x16xf32>
    %7 = vector.broadcast %6 : vector<1x16x16xf32> to vector<3x16x16xf32>
    %8 = arith.cmpf oeq, %3, %7 : vector<3x16x16xf32>
    %c3_i32 = arith.constant 3 : i32
    %9 = vector.broadcast %c3_i32 : i32 to vector<3x16x16xi32>
    %10 = arith.select %8, %4, %9 : vector<3x16x16xi1>, vector<3x16x16xi32>
    %cst_7 = arith.constant dense<2147483647> : vector<16x16xi32>
    %11 = vector.multi_reduction <minsi>, %10, %cst_7 [0] : vector<3x16x16xi32> to vector<16x16xi32>
    %12 = vector.shape_cast %11 : vector<16x16xi32> to vector<1x16x16xi32>
    %13 = vector.broadcast %12 : vector<1x16x16xi32> to vector<3x16x16xi32>
    %14 = arith.cmpi eq, %4, %13 : vector<3x16x16xi32>
    %cst_8 = arith.constant 0.000000e+00 : f32
    %15 = vector.broadcast %cst_8 : f32 to vector<3x16x16xf32>
    %16 = arith.select %14, %1, %15 : vector<3x16x16xi1>, vector<3x16x16xf32>
    %cst_9 = arith.constant dense<0.000000e+00> : vector<16x16xf32>
    %17 = vector.multi_reduction <add>, %16, %cst_9 [0] : vector<3x16x16xf32> to vector<16x16xf32>
    %cst_10 = arith.constant 1.000000e+00 : f32
    %18 = vector.broadcast %cst_10 : f32 to vector<16x16xf32>
    %19 = arith.subf %18, %17 : vector<16x16xf32>
    %20 = arith.mulf %19, %19 : vector<16x16xf32>
    %cst_11 = arith.constant 9.99999996E-13 : f32
    %cst_12 = arith.constant 1.000000e+00 : f32
    %21 = vector.broadcast %cst_11 : f32 to vector<16x16xf32>
    %22 = arith.maximumf %21, %17 : vector<16x16xf32>
    %23 = vector.broadcast %cst_12 : f32 to vector<16x16xf32>
    %24 = arith.minimumf %23, %22 : vector<16x16xf32>
    %25 = math.log %24 : vector<16x16xf32>
    %c0_i32 = arith.constant 0 : i32
    %26 = arith.cmpi eq, %arg1, %c0_i32 : i32
    %27 = arith.extui %26 : i1 to i32
    %c0_i32_13 = arith.constant 0 : i32
    %28 = arith.cmpi ne, %27, %c0_i32_13 : i32
    scf.if %28 {
      %c0_17 = arith.constant 0 : index
      %c0_18 = arith.constant 0 : index
      %35 = vector.load %arg5[%c0_17, %c0_18] : memref<16x16xf32, #tpu.memory_space<vmem>>, vector<16x16xf32>
      tpu.vector_store %arg5[%c0_17, %c0_18], %20 {strides = array<i32>} : memref<16x16xf32, #tpu.memory_space<vmem>>, vector<16x16xf32>,
      %c0_19 = arith.constant 0 : index
      %c0_20 = arith.constant 0 : index
      %36 = vector.load %arg6[%c0_19, %c0_20] : memref<16x16xf32, #tpu.memory_space<vmem>>, vector<16x16xf32>
      tpu.vector_store %arg6[%c0_19, %c0_20], %25 {strides = array<i32>} : memref<16x16xf32, #tpu.memory_space<vmem>>, vector<16x16xf32>,
    } else {
    }
    %c0_i32_14 = arith.constant 0 : i32
    %29 = arith.cmpi sgt, %arg1, %c0_i32_14 : i32
    %30 = arith.extui %29 : i1 to i32
    %c0_i32_15 = arith.constant 0 : i32
    %31 = arith.cmpi ne, %30, %c0_i32_15 : i32
    scf.if %31 {
      %c0_17 = arith.constant 0 : index
      %c0_18 = arith.constant 0 : index
      %35 = vector.load %arg5[%c0_17, %c0_18] : memref<16x16xf32, #tpu.memory_space<vmem>>, vector<16x16xf32>
      %36 = arith.addf %35, %20 : vector<16x16xf32>
      %c0_19 = arith.constant 0 : index
      %c0_20 = arith.constant 0 : index
      %37 = vector.load %arg5[%c0_19, %c0_20] : memref<16x16xf32, #tpu.memory_space<vmem>>, vector<16x16xf32>
      tpu.vector_store %arg5[%c0_19, %c0_20], %36 {strides = array<i32>} : memref<16x16xf32, #tpu.memory_space<vmem>>, vector<16x16xf32>,
      %c0_21 = arith.constant 0 : index
      %c0_22 = arith.constant 0 : index
      %38 = vector.load %arg6[%c0_21, %c0_22] : memref<16x16xf32, #tpu.memory_space<vmem>>, vector<16x16xf32>
      %39 = arith.addf %38, %25 : vector<16x16xf32>
      %c0_23 = arith.constant 0 : index
      %c0_24 = arith.constant 0 : index
      %40 = vector.load %arg6[%c0_23, %c0_24] : memref<16x16xf32, #tpu.memory_space<vmem>>, vector<16x16xf32>
      tpu.vector_store %arg6[%c0_23, %c0_24], %39 {strides = array<i32>} : memref<16x16xf32, #tpu.memory_space<vmem>>, vector<16x16xf32>,
    } else {
    }
    %c1_i32 = arith.constant 1 : i32
    %32 = arith.cmpi eq, %arg1, %c1_i32 : i32
    %33 = arith.extui %32 : i1 to i32
    %c0_i32_16 = arith.constant 0 : i32
    %34 = arith.cmpi ne, %33, %c0_i32_16 : i32
    scf.if %34 {
      %c0_17 = arith.constant 0 : index
      %c0_18 = arith.constant 0 : index
      %35 = vector.load %arg5[%c0_17, %c0_18] : memref<16x16xf32, #tpu.memory_space<vmem>>, vector<16x16xf32>
      %36 = vector.shape_cast %35 : vector<16x16xf32> to vector<1x16x16xf32>
      %cst_19 = arith.constant dense<0.000000e+00> : vector<1xf32>
      %37 = vector.multi_reduction <add>, %36, %cst_19 [1, 2] : vector<1x16x16xf32> to vector<1xf32>
      %38 = vector.shape_cast %37 : vector<1xf32> to vector<1x1x1xf32>
      %39 = vector.extract %38[0, 0, 0] : f32 from vector<1x1x1xf32>
      %c0_20 = arith.constant 0 : index
      %c0_21 = arith.constant 0 : index
      %40 = memref.load %arg4[%c0_20, %c0_21] : memref<1x2xf32, #tpu.memory_space<smem>>
      memref.store %39, %arg4[%c0_20, %c0_21] : memref<1x2xf32, #tpu.memory_space<smem>>
      %c0_22 = arith.constant 0 : index
      %c0_23 = arith.constant 0 : index
      %41 = vector.load %arg6[%c0_22, %c0_23] : memref<16x16xf32, #tpu.memory_space<vmem>>, vector<16x16xf32>
      %42 = vector.shape_cast %41 : vector<16x16xf32> to vector<1x16x16xf32>
      %cst_24 = arith.constant dense<0.000000e+00> : vector<1xf32>
      %43 = vector.multi_reduction <add>, %42, %cst_24 [1, 2] : vector<1x16x16xf32> to vector<1xf32>
      %44 = vector.shape_cast %43 : vector<1xf32> to vector<1x1x1xf32>
      %45 = vector.extract %44[0, 0, 0] : f32 from vector<1x1x1xf32>
      %c0_25 = arith.constant 0 : index
      %c1 = arith.constant 1 : index
      %46 = memref.load %arg4[%c0_25, %c1] : memref<1x2xf32, #tpu.memory_space<smem>>
      memref.store %45, %arg4[%c0_25, %c1] : memref<1x2xf32, #tpu.memory_space<smem>>
    } else {
    }
    return
  }
  func.func @transform_0(%arg0: i32, %arg1: i32) -> (i32, i32, i32, i32) {
    %c0_i32 = arith.constant 0 : i32
    %c0_i32_0 = arith.constant 0 : i32
    %c0_i32_1 = arith.constant 0 : i32
    return %arg1, %c0_i32, %arg0, %c0_i32_0 : i32, i32, i32, i32
  }
  func.func @transform_1(%arg0: i32, %arg1: i32) -> (i32, i32, i32, i32) {
    %c0_i32 = arith.constant 0 : i32
    %c0_i32_0 = arith.constant 0 : i32
    %c0_i32_1 = arith.constant 0 : i32
    return %arg1, %c0_i32, %arg0, %c0_i32_0 : i32, i32, i32, i32
  }
  func.func @transform_2(%arg0: i32, %arg1: i32) -> (i32, i32) {
    %c0_i32 = arith.constant 0 : i32
    %c0_i32_0 = arith.constant 0 : i32
    return %arg0, %c0_i32 : i32, i32
  }
}

</mosaic_0001>

<bundles_post_ra>
// kernel: tpu_custom_call.1
= control target key start
LH: loop header
LB: loop body
LE: loop exit
PB: predicated region body
PF: predicated region fallthrough
CT: control target
= control target key end

     0   :  { %7 = vsyncpa [#allocation5], 0  ;;  %s937_s0 = inlined_call_operand.hbm [shape: f32[2,3,16,16], index: 0, kind: input, shape index: {}]   ;;  %s938_s1 = inlined_call_operand.hbm [shape: f32[2,3,16,16], index: 1, kind: input, shape index: {}]   ;;  %s939_s2 = inlined_call_operand.hbm [shape: f32[1,2], index: 2, kind: output, shape index: {}]  }
   0x1   :  { %9 = vsyncpa [#allocation5 + $0x1], 0 }
   0x2   :  { %10 = vsyncpa [#allocation8], 0 }
   0x3   :  { %12 = vsyncpa [#allocation8 + $0x1], 0 }
   0x4   :  { %13 = vsyncpa [#allocation6], 0  ;;  %s707_s9 = smov 0   ;;  %s709_s10 = smov 0  }
   0x5   :  { %s711_s11 = smov 0   ;;  %s713_s12 = smov 0  }
   0x6   :  { %s715_s13 = smov 0   ;;  %s717_s14 = smov 0  }
   0x7 LB: > { %s458_s15 = sadd.s32 4294967295, %s684_s14   ;;  %s28_s16 = sadd.s32 1, %s680_s13  ;;  %s684_s14 = sphi %s717_s14, %s19_s14   ;;  %s680_s13 = sphi %s715_s13, %s949_s13   ;;  %s676_s12 = sphi %s713_s12, %s948_s12   ;;  %s672_s11 = sphi %s711_s11, %s947_s11   ;;  %s668_s10 = sphi %s709_s10, %s946_s10   ;;  %s664_s9 = sphi %s707_s9, %s945_s9  }
   0x8   : > { %p29_p0 = scmp.ge.s32.totalorder %s28_s16, 2  ;;  %s40_s17 = sadd.s32 1, %s672_s11 }
   0x9   : > { %p47_p1 = scmp.ne.s32.totalorder %s672_s11, %s668_s10  ;;  %p48_p2 = scmp.eq.s32.totalorder %s684_s14, 0 }
   0xa   : > { %s951_s16 = smov (%p29_p0, %s28_s16), 0  ;;  %p53_p4 = scmp.ne.s32.totalorder %s668_s10, %s664_s9 }
   0xb   : > { %p49_p3 = por %p48_p2, %p47_p1  ;;  %s35_s18 = ssub.s32 %s680_s13, %s951_s16 }
   0xc   : > { %p54_p5 = scmp.eq.s32.totalorder %s458_s15, 0  ;;  %p38_p6 = scmp.eq.s32.totalorder %s35_s18, 0 }
   0xd   : > { %p495_p8 = scmp.lt.s32.totalorder %s684_s14, 2  ;;  %s757_s21 = sand.u32 1, %s672_s11  }
   0xe   : > { %p748_p7 = por %p54_p5, %p53_p4  ;;  %s472_s22 = smul.u32 768, %s680_s13 }
   0xf   : > { %s754_s20 = scalar_select %p38_p6, %s672_s11, %s40_s17  }
  0x10   : > { %s941_s19 = scalar_select %p748_p7, 1, 0 }
  0x11   : > { %s471_s23 = smul.u32 48, %s757_s21  ;;  %s766_s26 = scalar_lea.hbm %s937_s0, %s472_s22 }
  0x12   : > { %p768_p9 = pnand %p495_p8, %p49_p3  ;;  %s132_s30 = scalar_lea.sflag [#allocation5], %s757_s21 }
  0x13   : > { %s135_s28 = scalar_lea.vmem [#allocation4], %s471_s23  ;;  %s554_s3 = scalar_lea.hbm %s766_s26, 768 }
  0x14   : > { %s144_s29 = sshll.u32 %s135_s28, 4  ;;  %p555_p10 = scmp.ne.s32.totalorder %s766_s26, %s554_s3  ;;  %s774_s29 = int_to_ptr.vmem [resolvable:$true] %s144_s29 }
  0x15   : > { %p556_p11 = pneg %p768_p9  ;;  %s559_s6 = scalar_lea.hbm %s937_s0, 1536 }
  0x16   : > { %p560_p0 = scmp.lt.u32.totalorder %s766_s26, %s937_s0  ;;  %p561_p1 = scmp.lt.u32.totalorder %s559_s6, %s554_s3 }
  0x17   : > { %p557_p12 = pnand %p556_p11, %p555_p10  ;;  %p563_p3 = scmp.lt.u32.totalorder %s554_s3, %s766_s26 }
  0x18   : > { %p562_p2 = por %p561_p1, %p560_p0 }
  0x19   : > { %p558_p13 = pneg %p557_p12 }
  0x1a   : > { %p564_p4 = por %p563_p3, %p562_p2 }
  0x1c   : > { %p565_p5 = pnand %p564_p4, %p558_p13 }
  0x1e   : > { %568 = shalt.err (!%p565_p5)
}
  0x1f   : > { %s569_s9 = scalar_lea.vmem %s774_s29, 768  ;;  %s686_s17 = smov [#allocation4]  }
  0x20   : > { %p570_p6 = scmp.ne.s32.totalorder %s774_s29, %s569_s9  ;;  %s574_s18 = sshll.u32 %s686_s17, 4  ;;  %s575_s18 = int_to_ptr.vmem [resolvable:$false] %s574_s18 }
  0x21   : > { %s576_s24 = scalar_lea.vmem %s575_s18, 1536  ;;  %p577_p12 = scmp.lt.s32.totalorder %s774_s29, %s575_s18 }
  0x22   : > { %p572_p8 = pnand %p570_p6, %p556_p11  ;;  %p578_p0 = scmp.lt.s32.totalorder %s576_s24, %s569_s9 }
  0x24   : > { %p573_p10 = pneg %p572_p8  ;;  %p579_p1 = por %p578_p0, %p577_p12 }
  0x26   : > { %p580_p2 = pnand %p579_p1, %p573_p10 }
  0x28   : > { %583 = shalt.err (!%p580_p2)
}
  0x29   : > { %s687_s25 = smov 128   ;;  %s688_s28 = smov 8  }
  0x2a   : > { %491 = dma.hbm_to_vmem [thread:$0]  (!%p768_p9), %s766_s26, 768, %s774_s29, %s132_s30, %s687_s25, %s687_s25, %s688_s28  }
  0x2b   : > { %p463_p13 = scmp.ge.s32.totalorder %s684_s14, 1  ;;  %p175_p3 = scmp.lt.s32.totalorder %s684_s14, 3 }
  0x2c   : > { %s818_s6 = scalar_lea.hbm %s938_s1, %s472_s22  ;;  %s158_s7 = scalar_lea.vmem [#allocation7], %s471_s23 }
  0x2d   : > { %p809_p4 = pnand %p463_p13, %p175_p3  ;;  %s167_s8 = sshll.u32 %s158_s7, 4  ;;  %s822_s8 = int_to_ptr.vmem [resolvable:$true] %s167_s8 }
  0x2e   : > { %s155_s26 = scalar_lea.sflag [#allocation8], %s757_s21  ;;  %s584_s29 = scalar_lea.hbm %s818_s6, 768 }
  0x2f   : > { %p585_p5 = scmp.ne.s32.totalorder %s818_s6, %s584_s29  ;;  %s589_s22 = scalar_lea.hbm %s938_s1, 1536 }
  0x30   : > { %p590_p10 = scmp.lt.u32.totalorder %s818_s6, %s938_s1  ;;  %p591_p12 = scmp.lt.u32.totalorder %s589_s22, %s584_s29 }
  0x31   : > { %p587_p6 = pnand %p585_p5, %p556_p11  ;;  %p593_p1 = scmp.lt.u32.totalorder %s584_s29, %s818_s6 }
  0x32   : > { %p592_p0 = por %p591_p12, %p590_p10 }
  0x33   : > { %p588_p8 = pneg %p587_p6 }
  0x34   : > { %p594_p2 = por %p593_p1, %p592_p0 }
  0x36   : > { %p595_p13 = pnand %p594_p2, %p588_p8 }
  0x38   : > { %598 = shalt.err (!%p595_p13)
}
  0x39   : > { %s599_s23 = scalar_lea.vmem %s822_s8, 768  ;;  %s689_s24 = smov [#allocation7]  }
  0x3a   : > { %p600_p3 = scmp.ne.s32.totalorder %s822_s8, %s599_s23  ;;  %s604_s4 = sshll.u32 %s689_s24, 4  ;;  %s605_s4 = int_to_ptr.vmem [resolvable:$false] %s604_s4 }
  0x3b   : > { %s606_s5 = scalar_lea.vmem %s605_s4, 1536  ;;  %p607_p7 = scmp.lt.s32.totalorder %s822_s8, %s605_s4 }
  0x3c   : > { %p602_p5 = pnand %p600_p3, %p556_p11  ;;  %p608_p10 = scmp.lt.s32.totalorder %s606_s5, %s599_s23 }
  0x3e   : > { %p603_p6 = pneg %p602_p5  ;;  %p609_p12 = por %p608_p10, %p607_p7 }
  0x40   : > { %p610_p0 = pnand %p609_p12, %p603_p6 }
  0x42   : > { %613 = shalt.err (!%p610_p0)
}
  0x43   : > { %494 = dma.hbm_to_vmem [thread:$0]  (!%p768_p9), %s818_s6, 768, %s822_s8, %s155_s26, %s687_s25, %s687_s25, %s688_s28  }
  0x44   : > { %179 = sbr.rel (%p809_p4) target bundleno = 363 (0x16b), region = 28  ;;  %s181_s7 = sand.u32 (!%p809_p4), 1, %s668_s10  }
  0x45   : > { %s475_s29 = smul.u32 (!%p809_p4), 48, %s181_s7  ;;  %s182_s30 = scalar_lea.sflag (!%p809_p4), [#allocation5], %s181_s7 }
  0x46   : > { %p944_p7 = scmp.ne.s32.totalorder (!%p809_p4), %s941_s19, 0 }
  0x47   : > { %s856_s9 = scalar_lea.vmem (!%p809_p4), [#allocation4], %s475_s29 }
  0x4b   : > { %651 = dma.done.wait (%p944_p7), %s182_s30, 768  }
  0x4c   : > { %653 = vsyncadd (%p944_p7), %s182_s30, 4294966528  ;;  %s191_s21 = scalar_lea.sflag [#allocation8], %s181_s7  ;;  %s194_s27 = scalar_lea.vmem [#allocation7], %s475_s29 }
  0x4d   : > { %655 = dma.done.wait (%p944_p7), %s191_s21, 768  }
  0x4e   : > { %657 = vsyncadd (%p944_p7), %s191_s21, 4294966528  ;;  %vm229_vm0 = vcmask 130048   ;;  %v223_v0 = vld [vmem:[%s194_s27] sm:$0xff]  ;;  %v224_v1 = vld [vmem:[%s194_s27 + $0x8] sm:$0xff]  ;;  %v690_v16 = vmov 3   ;;  %p464_p9 = scmp.ne.s32.totalorder %s676_s12, 0 }
  0x4f   : > { %v225_v2 = vld [vmem:[%s194_s27 + $0x10] sm:$0xff]  ;;  %v226_v3 = vld [vmem:[%s194_s27 + $0x18] sm:$0xff]  ;;  %v227_v4 = vld [vmem:[%s194_s27 + $0x20] sm:$0xff]  ;;  %v230_v6 = vsel %vm229_vm0, %v223_v0, -inf  ;;  %v235_v7 = vsel %vm229_vm0, %v224_v1, -inf }
  0x50   : > { %v228_v5 = vld [vmem:[%s194_s27 + $0x28] sm:$0xff]  ;;  %v231_v8 = vsel %vm229_vm0, %v225_v2, -inf  ;;  %v232_v9 = vsel %vm229_vm0, %v227_v4, -inf  ;;  %v236_v10 = vsel %vm229_vm0, %v226_v3, -inf  ;;  %v217_v30 = vld [vmem:[%s856_s9] sm:$0xff]  ;;  %v219_v33 = vld [vmem:[%s856_s9 + $0x10] sm:$0xff] }
  0x51   : > { %v237_v11 = vsel %vm229_vm0, %v228_v5, -inf  ;;  %v233_v12 = vmax.f32 %v230_v6, %v232_v9  ;;  %v218_v31 = vld [vmem:[%s856_s9 + $0x8] sm:$0xff]  ;;  %v220_v34 = vld [vmem:[%s856_s9 + $0x18] sm:$0xff]  ;;  %v221_v35 = vld [vmem:[%s856_s9 + $0x20] sm:$0xff] }
  0x52   : > { %v238_v13 = vmax.f32 %v235_v7, %v237_v11  ;;  %v222_v37 = vld [vmem:[%s856_s9 + $0x28] sm:$0xff] }
  0x53   : > { %v234_v14 = vmax.f32 %v233_v12, %v231_v8 }
  0x54   : > { %v239_v15 = vmax.f32 %v238_v13, %v236_v10 }
  0x55   : > { %vm240_vm1 = vcmp.eq.f32.partialorder %v223_v0, %v234_v14  ;;  %vm242_vm3 = vcmp.eq.f32.partialorder %v225_v2, %v234_v14  ;;  %vm244_vm5 = vcmp.eq.f32.partialorder %v227_v4, %v234_v14 }
  0x56   : > { %vm241_vm2 = vcmp.eq.f32.partialorder %v224_v1, %v239_v15  ;;  %vm243_vm4 = vcmp.eq.f32.partialorder %v226_v3, %v239_v15  ;;  %vm245_vm6 = vcmp.eq.f32.partialorder %v228_v5, %v239_v15  ;;  %v246_v17 = vsel %vm240_vm1, 0, %v690_v16 }
  0x57   : > { %v247_v18 = vsel %vm241_vm2, 0, %v690_v16  ;;  %v248_v19 = vsel %vm242_vm3, 1, %v690_v16  ;;  %v249_v20 = vsel %vm243_vm4, 1, %v690_v16  ;;  %v250_v21 = vsel %vm244_vm5, 2, %v690_v16 }
  0x58   : > { %v251_v22 = vsel %vm245_vm6, 2, %v690_v16  ;;  %v252_v23 = vsel %vm229_vm0, %v246_v17, 2147483647  ;;  %v253_v24 = vsel %vm229_vm0, %v248_v19, 2147483647 }
  0x59   : > { %v254_v25 = vsel %vm229_vm0, %v250_v21, 2147483647  ;;  %v259_v26 = vsel %vm229_vm0, %v247_v18, 2147483647  ;;  %v260_v27 = vsel %vm229_vm0, %v249_v20, 2147483647 }
  0x5a   : > { %vm255_vm7 = vcmp.lt.s32.totalorder %v252_v23, %v254_v25  ;;  %v261_v28 = vsel %vm229_vm0, %v251_v22, 2147483647 }
  0x5b   : > { %v256_v29 = vsel %vm255_vm7, %v252_v23, %v254_v25  ;;  %vm262_vm8 = vcmp.lt.s32.totalorder %v259_v26, %v261_v28 }
  0x5c   : > { %vm257_vm9 = vcmp.lt.s32.totalorder %v256_v29, %v253_v24  ;;  %v263_v32 = vsel %vm262_vm8, %v259_v26, %v261_v28 }
  0x5d   : > { %v258_v36 = vsel %vm257_vm9, %v256_v29, %v253_v24  ;;  %vm264_vm10 = vcmp.lt.s32.totalorder %v263_v32, %v260_v27 }
  0x5e   : > { %v265_v38 = vsel %vm264_vm10, %v263_v32, %v260_v27  ;;  %vm266_vm11 = vcmp.eq.s32.totalorder %v258_v36, 0  ;;  %vm268_vm12 = vcmp.eq.s32.totalorder %v258_v36, 1  ;;  %vm270_vm13 = vcmp.eq.s32.totalorder %v258_v36, 2 }
  0x5f   : > { %vm267_vm14 = vcmp.eq.s32.totalorder %v265_v38, 0  ;;  %vm269_vm15 = vcmp.eq.s32.totalorder %v265_v38, 1  ;;  %vm271_vm1 = vcmp.eq.s32.totalorder %v265_v38, 2  ;;  %v272_v39 = vsel %vm266_vm11, %v217_v30, 0.0 }
  0x60   : > { %v273_v40 = vsel %vm267_vm14, %v218_v31, 0.0  ;;  %v274_v41 = vsel %vm268_vm12, %v219_v33, 0.0  ;;  %v275_v42 = vsel %vm269_vm15, %v220_v34, 0.0  ;;  %v276_v43 = vsel %vm270_vm13, %v221_v35, 0.0 }
  0x61   : > { %v277_v44 = vsel %vm271_vm1, %v222_v37, 0.0  ;;  %v278_v45 = vsel %vm229_vm0, %v272_v39, 0.0  ;;  %v279_v46 = vsel %vm229_vm0, %v274_v41, 0.0  ;;  %v281_v47 = vsel %vm229_vm0, %v276_v43, 0.0 }
  0x62   : > { %v280_v48 = vadd.f32 %v279_v46, %v278_v45  ;;  %v283_v49 = vsel %vm229_vm0, %v273_v40, 0.0  ;;  %v284_v50 = vsel %vm229_vm0, %v275_v42, 0.0  ;;  %v286_v51 = vsel %vm229_vm0, %v277_v44, 0.0 }
  0x63   : > { %v285_v52 = vadd.f32 %v284_v50, %v283_v49 }
  0x64   : > { %v282_v53 = vadd.f32 %v281_v47, %v280_v48 }
  0x65   : > { %v287_v54 = vadd.f32 %v286_v51, %v285_v52 }
  0x66   : > { %v288_v55 = vsub.f32 1.0, %v282_v53  ;;  %v292_v56 = vmax.f32 %v282_v53, 1e-12 }
  0x67   : > { %v289_v57 = vsub.f32 1.0, %v287_v54  ;;  %v293_v58 = vmax.f32 %v287_v54, 1e-12 }
  0x68   : > { %v290_v59 = vmul.f32 %v288_v55, %v288_v55  ;;  %v294_v60 = vmin.f32 %v292_v56, 1.0 }
  0x69   : > { %v291_v61 = vmul.f32 %v289_v57, %v289_v57  ;;  %v295_v62 = vmin.f32 %v293_v58, 1.0 }
  0x6a   : > { %550 = vlog2.f32 %v294_v60  ;;  %304 = vst.msk [vmem:[#allocation2] sm:$0xff] (!%p464_p9), %vm229_vm0, %v290_v59 }
  0x6b   : > { %552 = vlog2.f32 %v295_v62  ;;  %305 = vst.msk [vmem:[#allocation2 + $0x8] sm:$0xff] (!%p464_p9), %vm229_vm0, %v291_v61 }
  0x70   : > { %303 = sbr.rel (%p464_p9) target bundleno = 121 (0x79), region = 40 }
  0x74   : > { %v551_v63 = vpop.eup %550 }
  0x75   : > { %v553_v0 = vpop.eup %552  ;;  %v297_v1 = vmul.f32 0.6931472, %v551_v63 }
  0x76   : > { %v299_v2 = vmul.f32 0.6931472, %v553_v0 }
  0x77   : > { %306 = vst.msk [vmem:[#allocation3] sm:$0xff] %vm229_vm0, %v297_v1 }
  0x78   : > { %307 = vst.msk [vmem:[#allocation3 + $0x8] sm:$0xff] %vm229_vm0, %v299_v2 }
  0x79 PF: > { %p465_p11 = scmp.le.s32.totalorder %s676_s12, 0 }
  0x7a   : > { %v312_v3 = vld [vmem:[#allocation2] sm:$0xff] (!%p465_p11)  ;;  %v313_v4 = vld [vmem:[#allocation2 + $0x8] sm:$0xff] (!%p465_p11) }
  0x7b   : > { %311 = sbr.rel (%p465_p11) target bundleno = 132 (0x84), region = 44  ;;  %v314_v6 = vadd.f32 (!%p465_p11), %v312_v3, %v290_v59  ;;  %v315_v7 = vadd.f32 (!%p465_p11), %v313_v4, %v291_v61 }
  0x7d   : > { %316 = vst.msk [vmem:[#allocation2] sm:$0xff] (!%p465_p11), %vm229_vm0, %v314_v6  ;;  %317 = vst.msk [vmem:[#allocation2 + $0x8] sm:$0xff] (!%p465_p11), %vm229_vm0, %v315_v7 }
  0x7f   : > { %v319_v9 = vld [vmem:[#allocation3 + $0x8] sm:$0xff] (!%p465_p11) }
  0x80   : > { %v318_v5 = vld [vmem:[#allocation3] sm:$0xff] (!%p465_p11)  ;;  %v321_v10 = vadd.f32 (!%p465_p11), %v319_v9, %v299_v2 }
  0x81   : > { %v320_v8 = vadd.f32 (!%p465_p11), %v318_v5, %v297_v1 }
  0x82   : > { %323 = vst.msk [vmem:[#allocation3 + $0x8] sm:$0xff] %vm229_vm0, %v321_v10 }
  0x83   : > { %322 = vst.msk [vmem:[#allocation3] sm:$0xff] %vm229_vm0, %v320_v8 }
  0x84 PF: > { %p466_p4 = scmp.ne.s32.totalorder %s676_s12, 1 }
  0x86   : > { %327 = sbr.rel (%p466_p4) target bundleno = 348 (0x15c), region = 48  ;;  %v328_v11 = vld [vmem:[#allocation2] sm:$0xff] (!%p466_p4)  ;;  %v329_v12 = vld [vmem:[#allocation2 + $0x8] sm:$0xff] (!%p466_p4) }
  0x87   : > { %v330_v14 = vsel (!%p466_p4), %vm229_vm0, %v328_v11, 0.0  ;;  %v331_v15 = vsel (!%p466_p4), %vm229_vm0, %v329_v12, 0.0 }
  0x88   : > { %v332_v18 = vadd.f32 (!%p466_p4), %v331_v15, %v330_v14 }
  0x8a   : > { %v344_v13 = vld [vmem:[#allocation3] sm:$0xff] (!%p466_p4)  ;;  %333 = vadd.xlane.f32.xlu0 (!%p466_p4), %v332_v18 }
  0x8b   : > { %v345_v16 = vld [vmem:[#allocation3 + $0x8] sm:$0xff] (!%p466_p4)  ;;  %v346_v17 = vsel (!%p466_p4), %vm229_vm0, %v344_v13, 0.0 }
  0x8c   : > { %v347_v19 = vsel (!%p466_p4), %vm229_vm0, %v345_v16, 0.0 }
  0x8d   : > { %v348_v20 = vadd.f32 %v347_v19, %v346_v17 }
  0x8f   : > { %349 = vadd.xlane.f32.xlu0 %v348_v20 }
 0x117   : > { %v334_v21 = vpop.xlane.xlu0 %333 }
 0x118   : > { %v335_v22 = vrot.slane %v334_v21, 4 }
 0x11a   : > { %v336_v23 = vadd.f32 %v335_v22, %v334_v21 }
 0x11c   : > { %v350_v24 = vpop.xlane.xlu0 %349  ;;  %v337_v25 = vrot.slane %v336_v23, 2 }
 0x11d   : > { %v351_v26 = vrot.slane %v350_v24, 4 }
 0x11e   : > { %v338_v28 = vadd.f32 %v337_v25, %v336_v23 }
 0x11f   : > { %v352_v27 = vadd.f32 %v351_v26, %v350_v24 }
 0x120   : > { %v339_v30 = vrot.slane %v338_v28, 1 }
 0x121   : > { %v353_v29 = vrot.slane %v352_v27, 2 }
 0x122   : > { %v340_v32 = vadd.f32 %v339_v30, %v338_v28 }
 0x123   : > { %v354_v31 = vadd.f32 %v353_v29, %v352_v27 }
 0x124   : > { %476 = vpush %v340_v32 }
 0x125   : > { %v355_v33 = vrot.slane %v354_v31, 1 }
 0x127   : > { %v356_v34 = vadd.f32 %v355_v33, %v354_v31 }
 0x129   : > { %478 = vpush %v356_v34 }
 0x155   : > { %s477_s12 = spop %476 }
 0x156   : > { %343 = sst [smem:[#allocation9]] %s477_s12 }
 0x15a   : > { %s479_s19 = spop %478 }
 0x15b   : > { %359 = sst [smem:[#allocation9 + $0x1]] %s479_s19 }
 0x15c PF: > { %p496_p8 = scmp.eq.s32.totalorder %s458_s15, 1  ;;  %s614_s3 = scalar_lea.hbm %s939_s2, 16 }
 0x15d   : > { %p615_p1 = scmp.ne.s32.totalorder %s939_s2, %s614_s3  ;;  %p620_p3 = scmp.lt.u32.totalorder %s614_s3, %s939_s2 }
 0x15f   : > { %p616_p2 = pnand %p615_p1, %p496_p8 }
 0x161   : > { %p617_p13 = pneg %p616_p2 }
 0x163   : > { %p622_p5 = pnand %p620_p3, %p617_p13 }
 0x165   : > { %625 = shalt.err (!%p622_p5)
}
 0x166   : > { %s691_s17 = smov [#allocation9]  }
 0x167   : > { %485 = dma.smem_to_hbm (%p496_p8), %s691_s17, 16, %s939_s2, [#allocation6]  }
 0x168   : > { %659 = dma.done.wait (%p496_p8), [#allocation6], 16  }
 0x169   : > { %661 = vsyncadd (%p496_p8), [#allocation6], 4294967280 }
 0x16a   : > { %375 = sfence }
 0x16b PF: > { %s19_s14 = sadd.s32 1, %s684_s14   ;;  %s945_s9 = smov %s668_s10 }
 0x16c   : > { %p16_p6 = scmp.ge.s32.totalorder %s19_s14, 4   ;;  %s946_s10 = smov %s672_s11 }
 0x16d   : > { %s947_s11 = smov %s754_s20  ;;  %s948_s12 = smov %s680_s13 }
 0x16e   : > { %s949_s13 = smov %s951_s16  ;;  %18 = sbr.rel (!%p16_p6) target bundleno = 7 (0x7), region = 93 }
 0x175   :  { %381 = vsyncpa [#allocation5], 1 }
 0x176   :  { %383 = vsyncpa [#allocation5 + $0x1], 1 }
 0x177   :  { %384 = vsyncpa [#allocation8], 1 }
 0x178   :  { %386 = vsyncpa [#allocation8 + $0x1], 1 }
 0x179   :  { %387 = vsyncpa [#allocation6], 1 }
 0x17a   :  { %389 = vsyncpa [#allocation6 + $0x1], 1 }

</bundles_post_ra>
